<compile_context>
chip_gen: v7x
topology: tpu7x:2x2x1
jax: 0.10.0
libtpu: 0.0.40
codegen_flags: <defaults>
</compile_context>

<pallas_src>
import jax
import jax.numpy as jnp
from jax.experimental import pallas as pl
from jax.experimental.pallas import tpu as pltpu


# ----------------------------- Pallas kernels ------------------------------ #

def _conv_stats_kernel(x_ref, w_ref, stat_ref):
    # x_ref   : (1, TM, K_pad)    bf16 im2col tile
    # w_ref   : (K_pad, C_pad)    bf16 folded conv weight
    # stat_ref: (1, 1, 2, C_pad)  f32: row0 = sum(y), row1 = sum(y*y) over the tile
    y = jnp.dot(x_ref[0], w_ref[...], preferred_element_type=jnp.float32)
    s = jnp.sum(y, axis=0, keepdims=True)          # (1, C_pad)
    ss = jnp.sum(y * y, axis=0, keepdims=True)     # (1, C_pad)
    stat_ref[0, 0] = jnp.concatenate([s, ss], axis=0)


def _conv_bn_relu_kernel(x_ref, w_ref, ss_ref, o_ref):
    # x_ref : (1, TM, K_pad) bf16 ; w_ref: (K_pad, C_pad) bf16
    # ss_ref: (2, C_pad) f32 (row0 scale, row1 shift)
    # o_ref : (1, C_pad, TM) f32 -- tile transposed in-kernel (XLU vxpose) so the
    #         HBM output is already channel-major (NCHW after a plain reshape).
    y = jnp.dot(x_ref[0], w_ref[...], preferred_element_type=jnp.float32)
    y = jnp.maximum(y * ss_ref[0:1, :] + ss_ref[1:2, :], 0.0)
    o_ref[0] = y.T                                 # 2-D transpose -> XLU


# ------------------------------- JAX wrapper -------------------------------- #

def _round_up(a, b):
    return (a + b - 1) // b * b


def _mxu_pad(d):
    # 128-lane minimum; 256-multiples once the dim exceeds one vreg width
    # (matches v6e/v7x 2x256^2 MXU tiles; don't inflate tiny dims further).
    return _round_up(d, 128) if d <= 128 else _round_up(d, 256)


def _derive_tiling(m, k_pad, c_pad):
    """Spatial tile + scoped-VMEM request sized from the double-buffered working set."""
    budget = 40 * 1024 * 1024          # keep well inside v7x's 64 MiB physical VMEM

    def footprint(tm_):
        return (2 * tm_ * k_pad * 2    # bf16 im2col tile, double-buffered
                + 2 * k_pad * c_pad * 2  # bf16 weight, double-buffered
                + 2 * tm_ * c_pad * 4)   # f32 output tile, double-buffered

    tm = min(512, _round_up(m, 8))     # if < 512 it equals the full (padded) M dim
    if footprint(tm) > budget:
        for cand in (384, 256, 128):   # multiples of 128 keep the transposed
            if cand < tm:              # output tile lane-dense
                tm = cand
                if footprint(tm) <= budget:
                    break
    vmem_limit = int(min(48 * 1024 * 1024,
                         max(footprint(tm) + 8 * 1024 * 1024, 32 * 1024 * 1024)))
    return tm, vmem_limit


def _extract_patches_nhwc(x_nhwc, kh, kw, stride, padding, dilation):
    """Build (N, Ho*Wo, KH*KW*Cin) im2col matrix (pure data movement / glue)."""
    n, h, w, cin = x_nhwc.shape
    xp = jnp.pad(x_nhwc, ((0, 0), (padding, padding), (padding, padding), (0, 0)))
    hp, wp = h + 2 * padding, w + 2 * padding
    ho = (hp - dilation * (kh - 1) - 1) // stride + 1
    wo = (wp - dilation * (kw - 1) - 1) // stride + 1
    patches = []
    for ih in range(kh):
        for iw in range(kw):
            h0, w0 = ih * dilation, iw * dilation
            p = jax.lax.slice(
                xp,
                (0, h0, w0, 0),
                (n, h0 + (ho - 1) * stride + 1, w0 + (wo - 1) * stride + 1, cin),
                (1, stride, stride, 1),
            )  # (N, Ho, Wo, Cin)
            patches.append(p.reshape(n, ho * wo, cin))
    # last-axis order is (kh, kw, cin) with cin fastest -> matches weight reshape below
    return jnp.concatenate(patches, axis=-1), ho, wo


def conv_bn_relu_forward(x_nchw, conv_weight_oihw, bn_gamma, bn_beta,
                         *, stride=1, padding=0, dilation=1, eps=1e-5):
    n, cin, h, w = x_nchw.shape
    cout, cin_w, kh, kw = conv_weight_oihw.shape
    assert cin == cin_w
    k_dim = kh * kw * cin

    # im2col in bf16 (bf16 rounding of x before any arithmetic -> MXU operands).
    x_nhwc = jnp.transpose(x_nchw, (0, 2, 3, 1)).astype(jnp.bfloat16)
    x_col, ho, wo = _extract_patches_nhwc(x_nhwc, kh, kw, stride, padding, dilation)
    m = ho * wo

    k_pad = _mxu_pad(k_dim)
    c_pad = _mxu_pad(cout)
    tm, vmem_limit = _derive_tiling(m, k_pad, c_pad)
    m_pad = _round_up(m, tm)
    n_mt = m_pad // tm

    # Zero-pad spatial rows and contraction columns -> lane-dense bf16 patch matrix.
    x_col = jnp.pad(x_col, ((0, 0), (0, m_pad - m), (0, k_pad - k_dim)))

    # (Cout, Cin, KH, KW) -> (KH, KW, Cin, Cout) -> (KK*Cin, Cout), zero-padded, bf16.
    w2 = jnp.transpose(conv_weight_oihw, (2, 3, 1, 0)).reshape(k_dim, cout)
    w2 = jnp.pad(w2.astype(jnp.float32),
                 ((0, k_pad - k_dim), (0, c_pad - cout))).astype(jnp.bfloat16)

    params = pltpu.CompilerParams(
        dimension_semantics=("parallel", "parallel"),
        vmem_limit_bytes=vmem_limit)

    # ---- pass 1: per-tile channel sum / sum-of-squares (conv never written to HBM) ----
    partial_stats = pl.pallas_call(
        _conv_stats_kernel,
        out_shape=jax.ShapeDtypeStruct((n, n_mt, 2, c_pad), jnp.float32),
        grid=(n, n_mt),
        in_specs=[
            pl.BlockSpec((1, tm, k_pad), lambda b, mi: (b, mi, 0)),
            pl.BlockSpec((k_pad, c_pad), lambda b, mi: (0, 0)),
        ],
        out_specs=pl.BlockSpec((1, 1, 2, c_pad), lambda b, mi: (b, mi, 0, 0)),
        compiler_params=params,
    )(x_col, w2)

    # ---- BN finalize: tiny per-channel math on (2, C_pad) vectors, plain XLA ----
    count = float(n * m)                       # zero-padded rows contribute exactly 0
    stats = jnp.sum(partial_stats, axis=(0, 1))            # (2, c_pad)
    mean = stats[0] / count
    var = jnp.maximum(stats[1] / count - mean * mean, 0.0)  # biased var (training BN)
    inv = jax.lax.rsqrt(var + eps)
    gamma_p = jnp.pad(bn_gamma.astype(jnp.float32), (0, c_pad - cout))
    beta_p = jnp.pad(bn_beta.astype(jnp.float32), (0, c_pad - cout))
    scale = gamma_p * inv
    shift = beta_p - mean * scale
    scale_shift = jnp.stack([scale, shift], axis=0)          # (2, c_pad)

    # ---- pass 2: recompute conv tile, fused scale/shift + ReLU + NCHW transpose ----
    y = pl.pallas_call(
        _conv_bn_relu_kernel,
        out_shape=jax.ShapeDtypeStruct((n, c_pad, m_pad), jnp.float32),
        grid=(n, n_mt),
        in_specs=[
            pl.BlockSpec((1, tm, k_pad), lambda b, mi: (b, mi, 0)),
            pl.BlockSpec((k_pad, c_pad), lambda b, mi: (0, 0)),
            pl.BlockSpec((2, c_pad), lambda b, mi: (0, 0)),
        ],
        out_specs=pl.BlockSpec((1, c_pad, tm), lambda b, mi: (b, 0, mi)),
        compiler_params=params,
    )(x_col, w2, scale_shift)

    # Strip channel / spatial padding; data is already channel-major (NCHW).
    return y[:, :cout, :m].reshape(n, cout, ho, wo)


# --------------------------- pure-JAX reference ----------------------------- #

def _reference(x_nchw, conv_weight_oihw, bn_gamma, bn_beta,
               *, stride, padding, dilation, eps):
    conv = jax.lax.conv_general_dilated(
        x_nchw.astype(jnp.float32), conv_weight_oihw.astype(jnp.float32),
        window_strides=(stride, stride),
        padding=[(padding, padding), (padding, padding)],
        rhs_dilation=(dilation, dilation),
        dimension_numbers=("NCHW", "OIHW", "NCHW"),
        precision=jax.lax.Precision.HIGHEST,
    )
    mean = conv.mean(axis=(0, 2, 3), keepdims=True)
    var = jnp.square(conv - mean).mean(axis=(0, 2, 3), keepdims=True)
    g = bn_gamma.reshape(1, -1, 1, 1)
    b = bn_beta.reshape(1, -1, 1, 1)
    return jnp.maximum((conv - mean) * jax.lax.rsqrt(var + eps) * g + b, 0.0)


# ----------------------------------- main ----------------------------------- #

if __name__ == "__main__":
    # conv_bn_relu(in_channels=4, out_channels=8, kernel_size=3, stride=1,
    #              padding=1, dilation=1, bias=False)
    N, CIN, H, W = 2, 4, 16, 16
    COUT, K = 8, 3
    STRIDE, PAD, DIL, EPS = 1, 1, 1, 1e-5

    key = jax.random.PRNGKey(0)
    kx, kw_, kg, kb = jax.random.split(key, 4)
    x = jax.random.normal(kx, (N, CIN, H, W), jnp.float32)
    conv_w = jax.random.normal(kw_, (COUT, CIN, K, K), jnp.float32) * 0.1
    gamma = 1.0 + 0.1 * jax.random.normal(kg, (COUT,), jnp.float32)
    beta = 0.1 * jax.random.normal(kb, (COUT,), jnp.float32)

    out = conv_bn_relu_forward(x, conv_w, gamma, beta,
                               stride=STRIDE, padding=PAD, dilation=DIL, eps=EPS)
    out = jax.block_until_ready(out)
    assert out.shape == (N, COUT, H, W), out.shape

    # Tight check: reference fed the same bf16-rounded MXU operands (f32 math).
    ref_bf16 = _reference(
        x.astype(jnp.bfloat16).astype(jnp.float32),
        conv_w.astype(jnp.bfloat16).astype(jnp.float32),
        gamma, beta, stride=STRIDE, padding=PAD, dilation=DIL, eps=EPS)
    assert jnp.allclose(out, ref_bf16, rtol=2e-3, atol=2e-3), \
        "mismatch vs bf16-operand reference"

    # Module-semantics (pure f32) reference — loose tol accounts for bf16 MXU operands.
    ref_f32 = _reference(x, conv_w, gamma, beta,
                         stride=STRIDE, padding=PAD, dilation=DIL, eps=EPS)
    assert jnp.allclose(out, ref_f32, rtol=5e-2, atol=5e-2), \
        "mismatch vs f32 reference"

    print("KERNEL_OK")
</pallas_src>

<mosaic_0001>
module attributes {stable_mosaic.version = 11 : i64} {
  func.func @_conv_stats_kernel(%arg0: i32, %arg1: i32, %arg2: memref<1x256x128xbf16, #tpu.memory_space<vmem>>, %arg3: memref<128x128xbf16, #tpu.memory_space<vmem>>, %arg4: memref<1x1x2x128xf32, #tpu.memory_space<vmem>>) attributes {dimension_semantics = [#tpu.dimension_semantics<parallel>, #tpu.dimension_semantics<parallel>], iteration_bounds = array<i64: 2, 1>, scalar_prefetch = 0 : i64, scratch_operands = 0 : i64, tpu.core_type = #tpu.core_type<tc>, window_params = [{transform_indices = @transform_0, window_bounds = array<i64: 1, 256, 128>}, {pipeline_mode = #tpu.pipeline_mode<synchronous>, transform_indices = @transform_1, window_bounds = array<i64: 128, 128>}, {transform_indices = @transform_2, window_bounds = array<i64: 1, 1, 2, 128>}]} {
    %c0 = arith.constant 0 : index
    %c0_0 = arith.constant 0 : index
    %c0_1 = arith.constant 0 : index
    %0 = vector.load %arg2[%c0, %c0_0, %c0_1] : memref<1x256x128xbf16, #tpu.memory_space<vmem>>, vector<1x256x128xbf16>
    %1 = vector.shape_cast %0 : vector<1x256x128xbf16> to vector<256x128xbf16>
    %c0_2 = arith.constant 0 : index
    %c0_3 = arith.constant 0 : index
    %2 = vector.load %arg3[%c0_2, %c0_3] : memref<128x128xbf16, #tpu.memory_space<vmem>>, vector<128x128xbf16>
    %cst = arith.constant dense<0.000000e+00> : vector<256x128xf32>
    %3 = tpu.matmul %1, %2, %cst {dimension_numbers = #tpu.dot_dimension_numbers<[1], [0], [0], [1], [0, 0, 1, 1], [], []>} : vector<256x128xbf16>, vector<128x128xbf16>, vector<256x128xf32> -> vector<256x128xf32>
    %cst_4 = arith.constant dense<0.000000e+00> : vector<128xf32>
    %4 = vector.multi_reduction <add>, %3, %cst_4 [0] : vector<256x128xf32> to vector<128xf32>
    %5 = vector.shape_cast %4 : vector<128xf32> to vector<1x128xf32>
    %6 = arith.mulf %3, %3 : vector<256x128xf32>
    %cst_5 = arith.constant dense<0.000000e+00> : vector<128xf32>
    %7 = vector.multi_reduction <add>, %6, %cst_5 [0] : vector<256x128xf32> to vector<128xf32>
    %8 = vector.shape_cast %7 : vector<128xf32> to vector<1x128xf32>
    %9 = tpu.concatenate %5, %8 in 0 : vector<1x128xf32>, vector<1x128xf32> -> vector<2x128xf32>
    %c0_6 = arith.constant 0 : index
    %c0_7 = arith.constant 0 : index
    %c0_8 = arith.constant 0 : index
    %c0_9 = arith.constant 0 : index
    %10 = vector.load %arg4[%c0_6, %c0_7, %c0_8, %c0_9] : memref<1x1x2x128xf32, #tpu.memory_space<vmem>>, vector<1x1x2x128xf32>
    %11 = vector.shape_cast %10 : vector<1x1x2x128xf32> to vector<2x128xf32>
    %12 = vector.shape_cast %9 : vector<2x128xf32> to vector<1x1x2x128xf32>
    tpu.vector_store %arg4[%c0_6, %c0_7, %c0_8, %c0_9], %12 {strides = array<i32>} : memref<1x1x2x128xf32, #tpu.memory_space<vmem>>, vector<1x1x2x128xf32>,
    return
  }
  func.func @transform_0(%arg0: i32, %arg1: i32) -> (i32, i32, i32) {
    %c0_i32 = arith.constant 0 : i32
    %c0_i32_0 = arith.constant 0 : i32
    return %arg0, %arg1, %c0_i32 : i32, i32, i32
  }
  func.func @transform_1(%arg0: i32, %arg1: i32) -> (i32, i32) {
    %c0_i32 = arith.constant 0 : i32
    %c0_i32_0 = arith.constant 0 : i32
    %c0_i32_1 = arith.constant 0 : i32
    return %c0_i32, %c0_i32_0 : i32, i32
  }
  func.func @transform_2(%arg0: i32, %arg1: i32) -> (i32, i32, i32, i32) {
    %c0_i32 = arith.constant 0 : i32
    %c0_i32_0 = arith.constant 0 : i32
    %c0_i32_1 = arith.constant 0 : i32
    return %arg0, %arg1, %c0_i32, %c0_i32_0 : i32, i32, i32, i32
  }
}

</mosaic_0001>

<bundles_post_ra>
// kernel: tpu_custom_call.1
= control target key start
LH: loop header
LB: loop body
LE: loop exit
PB: predicated region body
PF: predicated region fallthrough
CT: control target
= control target key end

     0   :  { %7 = vsyncpa [#allocation3], 0  ;;  %s1452_s0 = inlined_call_operand.hbm [shape: bf16[2,256,128], index: 0, kind: input, shape index: {}]   ;;  %s1453_s1 = inlined_call_operand.hbm [shape: bf16[128,128], index: 1, kind: input, shape index: {}]   ;;  %s1454_s2 = inlined_call_operand.hbm [shape: f32[2,1,2,128], index: 2, kind: output, shape index: {}]  }
   0x1   :  { %9 = vsyncpa [#allocation3 + $0x1], 0 }
   0x2   :  { %10 = vsyncpa [#allocation6], 0 }
   0x3   :  { %11 = vsyncpa [#allocation4], 0 }
   0x4   :  { %13 = vsyncpa [#allocation4 + $0x1], 0  ;;  %s1160_s9 = smov 0   ;;  %s1162_s10 = smov 0  }
   0x5   :  { %s1164_s11 = smov 0   ;;  %s1166_s12 = smov 0  }
   0x6   :  { %s1168_s13 = smov 0   ;;  %s1170_s14 = smov 0  }
   0x7 LB: > { %s766_s15 = sadd.s32 4294967295, %s1138_s14   ;;  %s767_s16 = sadd.s32 4294967294, %s1138_s14   ;;  %s1138_s14 = sphi %s1170_s14, %s19_s14   ;;  %s1134_s13 = sphi %s1168_s13, %s1478_s13   ;;  %s1130_s12 = sphi %s1166_s12, %s1477_s12   ;;  %s1126_s11 = sphi %s1164_s11, %s1476_s11   ;;  %s1122_s10 = sphi %s1162_s10, %s1475_s10   ;;  %s1118_s9 = sphi %s1160_s9, %s1474_s9  }
   0x8   : > { %p53_p0 = scmp.ne.s32.totalorder %s1122_s10, %s1118_s9  ;;  %p1194_p1 = scmp.eq.s32.totalorder %s766_s15, 0 }
   0x9   : > { %p1198_p2 = scmp.eq.s32.totalorder %s766_s15, 1  ;;  %p106_p3 = scmp.eq.s32.totalorder %s767_s16, 1 }
   0xa   : > { %s1459_s17 = scalar_select %p1194_p1, 1, 0 }
   0xb   : > { %s1460_s18 = scalar_select %p1198_p2, 1, 0 }
   0xc   : > { %p1204_p4 = por %p1194_p1, %p53_p0  ;;  %p768_p5 = scmp.ge.s32.totalorder %s1138_s14, 1 }
   0xd   : > { %p1209_p6 = por %p106_p3, %p53_p0  ;;  %p113_p7 = scmp.lt.s32.totalorder %s1138_s14, 3 }
   0xe   : > { %s1461_s19 = scalar_select %p1204_p4, 1, 0 }
   0xf   : > { %s1462_s20 = scalar_select %p1209_p6, 1, 0 }
  0x10   : > { %p1214_p8 = pnand %p768_p5, %p113_p7  ;;  %s1140_s22 = smov [#allocation5]  }
  0x11   : > { %s125_s23 = sshll.u32 %s1140_s22, 4  ;;  %s31_s25 = sadd.s32 1, %s1134_s13  ;;  %s126_s23 = int_to_ptr.vmem [resolvable:$true] %s125_s23 }
  0x12   : > { %s1463_s21 = scalar_select %p1214_p8, 1, 0 }
  0x13   : > { %p903_p9 = pneg %p1214_p8  ;;  %s994_s28 = scalar_lea.hbm %s1453_s1, 1024 }
  0x14   : > { %p995_p12 = scmp.ne.s32.totalorder %s1453_s1, %s994_s28  ;;  %p1001_p5 = scmp.lt.u32.totalorder %s994_s28, %s1453_s1 }
  0x15   : > { %p1223_p11 = pnand %p903_p9, %p1194_p1 }
  0x17   : > { %p996_p13 = pneg %p1223_p11 }
  0x19   : > { %p997_p0 = pnand %p996_p13, %p995_p12 }
  0x1b   : > { %p998_p3 = pneg %p997_p0 }
  0x1d   : > { %p1003_p7 = pnand %p1001_p5, %p998_p3 }
  0x1f   : > { %1006 = shalt.err (!%p1003_p7)
}
  0x20   : > { %s1007_s5 = scalar_lea.vmem %s126_s23, 1024  ;;  %p1015_p1 = scmp.lt.s32.totalorder %s126_s23, %s126_s23 }
  0x21   : > { %p1008_p9 = scmp.ne.s32.totalorder %s126_s23, %s1007_s5  ;;  %p1016_p4 = scmp.lt.s32.totalorder %s1007_s5, %s1007_s5 }
  0x23   : > { %p1010_p10 = pnand %p1008_p9, %p996_p13  ;;  %p1017_p8 = por %p1016_p4, %p1015_p1 }
  0x25   : > { %p1011_p6 = pneg %p1010_p10 }
  0x27   : > { %p1018_p2 = pnand %p1017_p8, %p1011_p6 }
  0x29   : > { %1021 = shalt.err (!%p1018_p2)
}
  0x2a   : > { %s1141_s6 = smov 64   ;;  %s1142_s7 = smov 4  }
  0x2b   : > { %906 = dma.hbm_to_vmem [thread:$0]  (!%p1223_p11), %s1453_s1, 1024, %s126_s23, [#allocation6], %s1141_s6, %s1141_s6, %s1142_s7  }
  0x2c   : > { %p33_p1 = scmp.ge.s32.totalorder %s31_s25, 2  ;;  %s40_s16 = sadd.s32 1, %s1126_s11 }
  0x2d   : > { %p47_p2 = scmp.ne.s32.totalorder %s1126_s11, %s1122_s10  ;;  %p48_p4 = scmp.eq.s32.totalorder %s1138_s14, 0 }
  0x2e   : > { %s1480_s25 = smov (%p33_p1, %s31_s25), 0  ;;  %p1466_p8 = scmp.ne.s32.totalorder %s1460_s18, 0 }
  0x2f   : > { %p1253_p6 = por %p48_p4, %p47_p2  ;;  %s35_s26 = ssub.s32 %s1134_s13, %s1480_s25 }
  0x30   : > { %p1259_p10 = por %p1466_p8, %p47_p2  ;;  %p916_p12 = scmp.lt.s32.totalorder %s1138_s14, 2 }
  0x31   : > { %p38_p11 = scmp.eq.s32.totalorder %s35_s26, 0  ;;  %s139_s23 = sand.u32 1, %s1126_s11  }
  0x32   : > { %s771_s27 = sshll.u32 %s139_s23, 7  ;;  %s806_s29 = sshll.u32 %s1134_s13, 11 }
  0x33   : > { %s1268_s28 = scalar_select %p38_p11, %s1126_s11, %s40_s16  }
  0x34   : > { %s1274_s4 = scalar_lea.hbm %s1452_s0, %s806_s29  ;;  %s143_s18 = scalar_lea.vmem [#allocation2], %s771_s27 }
  0x35   : > { %s152_s5 = sshll.u32 %s143_s18, 4  ;;  %p1280_p13 = pnand %p916_p12, %p1253_p6  ;;  %s1276_s5 = int_to_ptr.vmem [resolvable:$true] %s152_s5 }
  0x36   : > { %s1284_s15 = scalar_lea.sflag [#allocation3], %s139_s23  ;;  %s1022_s16 = scalar_lea.hbm %s1274_s4, 2048 }
  0x37   : > { %p1023_p0 = scmp.ne.s32.totalorder %s1274_s4, %s1022_s16  ;;  %p1024_p3 = pneg %p1280_p13 }
  0x38   : > { %s1027_s22 = scalar_lea.hbm %s1452_s0, 4096  ;;  %p1028_p9 = scmp.lt.u32.totalorder %s1274_s4, %s1452_s0 }
  0x39   : > { %p1025_p5 = pnand %p1024_p3, %p1023_p0  ;;  %p1029_p1 = scmp.lt.u32.totalorder %s1027_s22, %s1022_s16 }
  0x3a   : > { %p1031_p4 = scmp.lt.u32.totalorder %s1022_s16, %s1274_s4 }
  0x3b   : > { %p1026_p7 = pneg %p1025_p5  ;;  %p1030_p2 = por %p1029_p1, %p1028_p9 }
  0x3d   : > { %p1032_p6 = por %p1031_p4, %p1030_p2 }
  0x3f   : > { %p1033_p8 = pnand %p1032_p6, %p1026_p7 }
  0x41   : > { %1036 = shalt.err (!%p1033_p8)
}
  0x42   : > { %s1037_s23 = scalar_lea.vmem %s1276_s5, 2048  ;;  %s1143_s3 = smov [#allocation2]  }
  0x43   : > { %p1038_p12 = scmp.ne.s32.totalorder %s1276_s5, %s1037_s23  ;;  %s1042_s18 = sshll.u32 %s1143_s3, 4  ;;  %s1043_s18 = int_to_ptr.vmem [resolvable:$false] %s1042_s18 }
  0x44   : > { %s1044_s26 = scalar_lea.vmem %s1043_s18, 4096  ;;  %p1045_p5 = scmp.lt.s32.totalorder %s1276_s5, %s1043_s18 }
  0x45   : > { %p1040_p11 = pnand %p1038_p12, %p1024_p3  ;;  %p1046_p9 = scmp.lt.s32.totalorder %s1044_s26, %s1037_s23 }
  0x47   : > { %p1041_p0 = pneg %p1040_p11  ;;  %p1047_p1 = por %p1046_p9, %p1045_p5 }
  0x49   : > { %p1048_p2 = pnand %p1047_p1, %p1041_p0 }
  0x4b   : > { %1051 = shalt.err (!%p1048_p2)
}
  0x4c   : > { %910 = dma.hbm_to_vmem [thread:$0]  (!%p1280_p13), %s1274_s4, 2048, %s1276_s5, %s1284_s15, %s1141_s6, %s1141_s6, %s1142_s7  }
  0x4d   : > { %p1469_p3 = scmp.ne.s32.totalorder %s1463_s21, 0 }
  0x4e   : > { %s1318_s16 = sand.u32 (!%p1469_p3), 1, %s1122_s10   ;;  %p1470_p7 = scmp.ne.s32.totalorder (!%p1469_p3), %s1461_s19, 0 }
  0x4f   : > { %164 = sbr.rel (%p1469_p3) target bundleno = 429 (0x1ad), region = 28  ;;  %s775_s27 = sshll.u32 (!%p1469_p3), %s1318_s16, 7 }
  0x50   : > { %s167_s22 = scalar_lea.sflag (!%p1469_p3), [#allocation3], %s1318_s16  ;;  %s1322_s29 = scalar_lea.vmem (!%p1469_p3), [#allocation2], %s775_s27 }
  0x56   : > { %1105 = dma.done.wait (%p1470_p7), %s167_s22, 2048  }
  0x57   : > { %1107 = vsyncadd (%p1470_p7), %s167_s22, 4294965248  ;;  %p1471_p13 = scmp.ne.s32.totalorder %s1459_s17, 0 }
  0x59   : > { %1109 = dma.done.wait (%p1471_p13), [#allocation6], 1024  }
  0x5a   : > { %1111 = vsyncadd (%p1471_p13), [#allocation6], 4294966272  ;;  %v970_v0 = vld [vmem:[#allocation5] sm:$0xff]   ;;  %v971_v1 = vld [vmem:[#allocation5 + $0x8] sm:$0xff]   ;;  %s777_s17 = sshll.u32 %s1318_s16, 1  ;;  %s803_s19 = sshll.u32 %s1130_s12, 5 }
  0x5b   : > { %831 = vmatprep.subr.bf16.mxu0 %v970_v0  ;;  %879 = vmatprep.subr.bf16.mxu1 %v970_v0  ;;  %v972_v2 = vld [vmem:[#allocation5 + $0x10] sm:$0xff]   ;;  %v973_v3 = vld [vmem:[#allocation5 + $0x18] sm:$0xff]   ;;  %v978_v4 = vld [vmem:[%s1322_s29] sm:$0xff]   ;;  %s194_s21 = scalar_lea.vmem [#allocation7], %s777_s17  ;;  %vm656_vm0 = vcmask 1040384   ;;  %s1403_s5 = scalar_lea.hbm %s1454_s2, %s803_s19 }
  0x5c   : > { %832 = vmatpush3.bf16.msra.mxu0 %v970_v0  ;;  %887 = vmatpush3.bf16.msra.mxu1 %v970_v0  ;;  %v974_v5 = vld [vmem:[#allocation5 + $0x20] sm:$0xff]   ;;  %v975_v6 = vld [vmem:[#allocation5 + $0x28] sm:$0xff]   ;;  %v976_v8 = vld [vmem:[#allocation5 + $0x30] sm:$0xff]   ;;  %s674_s6 = sshll.u32 %s194_s21, 4  ;;  %s660_s8 = scalar_lea.sflag [#allocation4], %s1318_s16  ;;  %s1405_s6 = int_to_ptr.vmem [resolvable:$true] %s674_s6 }
  0x5d   : > { %833 = vmatprep.subr.bf16.mxu0 %v971_v1  ;;  %880 = vmatprep.subr.bf16.mxu1 %v971_v1  ;;  %v986_v7 = vld [vmem:[%s1322_s29 + $0x40] sm:$0xff]   ;;  %v977_v9 = vld [vmem:[#allocation5 + $0x38] sm:$0xff]   ;;  %v979_v10 = vld [vmem:[%s1322_s29 + $0x8] sm:$0xff]   ;;  %s1052_s15 = scalar_lea.vmem %s1405_s6, 32  ;;  %s1144_s12 = smov [#allocation7]  }
  0x5e   : > { %847 = vmatprep.mubr.bf16.mxu0 %v978_v4  ;;  %863 = vmatprep.mubr.bf16.mxu1 %v986_v7  ;;  %v987_v11 = vld [vmem:[%s1322_s29 + $0x48] sm:$0xff]   ;;  %v980_v12 = vld [vmem:[%s1322_s29 + $0x10] sm:$0xff]   ;;  %v981_v14 = vld [vmem:[%s1322_s29 + $0x18] sm:$0xff]   ;;  %p1053_p4 = scmp.ne.s32.totalorder %s1405_s6, %s1052_s15  ;;  %s1056_s30 = sshll.u32 %s1144_s12, 4  ;;  %s1057_s30 = int_to_ptr.vmem [resolvable:$false] %s1056_s30 }
  0x5f   : > { %v988_v13 = vld [vmem:[%s1322_s29 + $0x50] sm:$0xff]   ;;  %v989_v15 = vld [vmem:[%s1322_s29 + $0x58] sm:$0xff]   ;;  %v982_v16 = vld [vmem:[%s1322_s29 + $0x20] sm:$0xff]   ;;  %s1058_s23 = scalar_lea.vmem %s1057_s30, 64  ;;  %p1059_p12 = scmp.lt.s32.totalorder %s1405_s6, %s1057_s30 }
  0x60   : > { %834 = vmatpush3.bf16.msra.mxu0 %v971_v1  ;;  %888 = vmatpush3.bf16.msra.mxu1 %v971_v1  ;;  %v990_v17 = vld [vmem:[%s1322_s29 + $0x60] sm:$0xff]   ;;  %v983_v18 = vld [vmem:[%s1322_s29 + $0x28] sm:$0xff]   ;;  %v984_v20 = vld [vmem:[%s1322_s29 + $0x30] sm:$0xff]   ;;  %p1054_p6 = pnand %p1053_p4, %p1259_p10  ;;  %p1060_p11 = scmp.lt.s32.totalorder %s1058_s23, %s1052_s15 }
  0x61   : > { %835 = vmatprep.subr.bf16.mxu0 %v972_v2  ;;  %881 = vmatprep.subr.bf16.mxu1 %v972_v2  ;;  %v991_v19 = vld [vmem:[%s1322_s29 + $0x68] sm:$0xff]   ;;  %v992_v21 = vld [vmem:[%s1322_s29 + $0x70] sm:$0xff]   ;;  %v985_v22 = vld [vmem:[%s1322_s29 + $0x38] sm:$0xff]  }
  0x62   : > { %v993_v23 = vld [vmem:[%s1322_s29 + $0x78] sm:$0xff]   ;;  %p1055_p8 = pneg %p1054_p6  ;;  %p1061_p0 = por %p1060_p11, %p1059_p12 }
  0x64   : > { %836 = vmatpush3.bf16.msra.mxu0 %v972_v2  ;;  %889 = vmatpush3.bf16.msra.mxu1 %v972_v2  ;;  %p1062_p5 = pnand %p1061_p0, %p1055_p8 }
  0x65   : > { %837 = vmatprep.subr.bf16.mxu0 %v973_v3  ;;  %882 = vmatprep.subr.bf16.mxu1 %v973_v3 }
  0x68   : > { %838 = vmatpush3.bf16.msra.mxu0 %v973_v3  ;;  %890 = vmatpush3.bf16.msra.mxu1 %v973_v3 }
  0x69   : > { %839 = vmatprep.subr.bf16.mxu0 %v974_v5  ;;  %883 = vmatprep.subr.bf16.mxu1 %v974_v5 }
  0x6c   : > { %840 = vmatpush3.bf16.msra.mxu0 %v974_v5  ;;  %891 = vmatpush3.bf16.msra.mxu1 %v974_v5 }
  0x6d   : > { %841 = vmatprep.subr.bf16.mxu0 %v975_v6  ;;  %884 = vmatprep.subr.bf16.mxu1 %v975_v6 }
  0x70   : > { %842 = vmatpush3.bf16.msra.mxu0 %v975_v6  ;;  %892 = vmatpush3.bf16.msra.mxu1 %v975_v6 }
  0x71   : > { %843 = vmatprep.subr.bf16.mxu0 %v976_v8  ;;  %885 = vmatprep.subr.bf16.mxu1 %v976_v8 }
  0x74   : > { %844 = vmatpush3.bf16.msra.mxu0 %v976_v8  ;;  %893 = vmatpush3.bf16.msra.mxu1 %v976_v8 }
  0x75   : > { %845 = vmatprep.subr.bf16.mxu0 %v977_v9  ;;  %886 = vmatprep.subr.bf16.mxu1 %v977_v9 }
  0x78   : > { %846 = vmatpush3.bf16.msra.mxu0 %v977_v9  ;;  %894 = vmatpush3.bf16.msra.mxu1 %v977_v9 }
  0x7b   : > { %848 = vmatmul.mubr.bf16.vlgmr.msra.gmra.mrb[0].mxu0 %v979_v10  ;;  %864 = vmatmul.mubr.bf16.vlgmr.msra.gmra.mrb[0].mxu1 %v987_v11 }
  0x7c   : > { %851 = vmatprep.mubr.bf16.mxu0 %v980_v12  ;;  %867 = vmatprep.mubr.bf16.mxu1 %v988_v13 }
  0x83   : > { %852 = vmatmul.mubr.bf16.gmra.mrb[4].mxu0 %v981_v14  ;;  %868 = vmatmul.mubr.bf16.gmra.mrb[4].mxu1 %v989_v15 }
  0x84   : > { %855 = vmatprep.mubr.bf16.mxu0 %v982_v16  ;;  %871 = vmatprep.mubr.bf16.mxu1 %v990_v17 }
  0x8b   : > { %856 = vmatmul.mubr.bf16.gmra.mrb[8].mxu0 %v983_v18  ;;  %872 = vmatmul.mubr.bf16.gmra.mrb[8].mxu1 %v991_v19 }
  0x8c   : > { %859 = vmatprep.mubr.bf16.mxu0 %v984_v20  ;;  %875 = vmatprep.mubr.bf16.mxu1 %v992_v21 }
  0x93   : > { %860 = vmatmul.mubr.bf16.gmra.mrb[12].mxu0 %v985_v22  ;;  %876 = vmatmul.mubr.bf16.gmra.mrb[12].mxu1 %v993_v23 }
 0x14e   : > { %v849_v24 = vpop.f32.mrb[0].mxu0  ;;  %v1348_v25 = vpop.f32.mrb[0].mxu1 }
 0x14f   : > { %v423_v26 = vpop.f32.mrb[1].mxu0  ;;  %v1350_v27 = vpop.f32.mrb[1].mxu1  ;;  %v589_v35 = vmul.f32 %v849_v24, %v849_v24 }
 0x150   : > { %v850_v28 = vpop.f32.mrb[2].mxu0  ;;  %v1352_v29 = vpop.f32.mrb[2].mxu1  ;;  %v587_v32 = vmul.f32 %v423_v26, %v423_v26 }
 0x151   : > { %v426_v30 = vpop.f32.mrb[3].mxu0  ;;  %v1354_v31 = vpop.f32.mrb[3].mxu1  ;;  %v590_v38 = vmul.f32 %v850_v28, %v850_v28 }
 0x152   : > { %v550_v33 = vadd.f32 %v426_v30, %v423_v26  ;;  %v588_v34 = vmul.f32 %v426_v30, %v426_v30 }
 0x154   : > { %v551_v36 = vadd.f32 %v849_v24, %v550_v33  ;;  %v619_v37 = vadd.f32 %v588_v34, %v587_v32 }
 0x156   : > { %v620_v39 = vadd.f32 %v619_v37, %v589_v35  ;;  %v853_v40 = vpop.f32.mrb[4].mxu0  ;;  %v552_v41 = vadd.f32 %v850_v28, %v551_v36  ;;  %v1356_v42 = vpop.f32.mrb[4].mxu1 }
 0x157   : > { %v439_v43 = vpop.f32.mrb[5].mxu0  ;;  %v1358_v44 = vpop.f32.mrb[5].mxu1  ;;  %v593_v55 = vmul.f32 %v853_v40, %v853_v40 }
 0x158   : > { %v553_v45 = vadd.f32 %v552_v41, %v439_v43  ;;  %v591_v46 = vmul.f32 %v439_v43, %v439_v43  ;;  %v621_v47 = vadd.f32 %v620_v39, %v590_v38  ;;  %v854_v48 = vpop.f32.mrb[6].mxu0  ;;  %v1360_v49 = vpop.f32.mrb[6].mxu1  ;;  %v603_v41 = vmul.f32 %v1350_v27, %v1350_v27 }
 0x159   : > { %v442_v50 = vpop.f32.mrb[7].mxu0  ;;  %v1362_v51 = vpop.f32.mrb[7].mxu1  ;;  %v594_v58 = vmul.f32 %v854_v48, %v854_v48 }
 0x15a   : > { %v622_v52 = vadd.f32 %v621_v47, %v591_v46  ;;  %v554_v53 = vadd.f32 %v553_v45, %v442_v50  ;;  %v592_v54 = vmul.f32 %v442_v50, %v442_v50  ;;  %v605_v50 = vmul.f32 %v1348_v25, %v1348_v25 }
 0x15c   : > { %v555_v56 = vadd.f32 %v853_v40, %v554_v53  ;;  %v623_v57 = vadd.f32 %v622_v52, %v592_v54  ;;  %v606_v54 = vmul.f32 %v1352_v29, %v1352_v29 }
 0x15e   : > { %v624_v59 = vadd.f32 %v623_v57, %v593_v55  ;;  %v857_v60 = vpop.f32.mrb[8].mxu0  ;;  %v556_v61 = vadd.f32 %v854_v48, %v555_v56  ;;  %v1364_v62 = vpop.f32.mrb[8].mxu1  ;;  %v604_v48 = vmul.f32 %v1354_v31, %v1354_v31 }
 0x15f   : > { %v455_v63 = vpop.f32.mrb[9].mxu0  ;;  %v519_v0 = vpop.f32.mrb[9].mxu1  ;;  %v597_v11 = vmul.f32 %v857_v60, %v857_v60 }
 0x160   : > { %v557_v1 = vadd.f32 %v556_v61, %v455_v63  ;;  %v595_v2 = vmul.f32 %v455_v63, %v455_v63  ;;  %v625_v3 = vadd.f32 %v624_v59, %v594_v58  ;;  %v858_v4 = vpop.f32.mrb[10].mxu0  ;;  %v1366_v5 = vpop.f32.mrb[10].mxu1 }
 0x161   : > { %v458_v6 = vpop.f32.mrb[11].mxu0  ;;  %v522_v7 = vpop.f32.mrb[11].mxu1  ;;  %v598_v14 = vmul.f32 %v858_v4, %v858_v4 }
 0x162   : > { %v626_v8 = vadd.f32 %v625_v3, %v595_v2  ;;  %v558_v9 = vadd.f32 %v557_v1, %v458_v6  ;;  %v596_v10 = vmul.f32 %v458_v6, %v458_v6 }
 0x164   : > { %v559_v12 = vadd.f32 %v857_v60, %v558_v9  ;;  %v627_v13 = vadd.f32 %v626_v8, %v596_v10  ;;  %v608_v60 = vmul.f32 %v1362_v51, %v1362_v51  ;;  %v612_v9 = vmul.f32 %v522_v7, %v522_v7 }
 0x166   : > { %v628_v15 = vadd.f32 %v627_v13, %v597_v11  ;;  %v861_v16 = vpop.f32.mrb[12].mxu0  ;;  %v560_v17 = vadd.f32 %v858_v4, %v559_v12  ;;  %v877_v18 = vpop.f32.mrb[12].mxu1 }
 0x167   : > { %v471_v19 = vpop.f32.mrb[13].mxu0  ;;  %v535_v20 = vpop.f32.mrb[13].mxu1  ;;  %v601_v35 = vmul.f32 %v861_v16, %v861_v16 }
 0x168   : > { %v561_v21 = vadd.f32 %v560_v17, %v471_v19  ;;  %v599_v22 = vmul.f32 %v471_v19, %v471_v19  ;;  %v629_v23 = vadd.f32 %v628_v15, %v598_v14  ;;  %v862_v24 = vpop.f32.mrb[14].mxu0  ;;  %v878_v26 = vpop.f32.mrb[14].mxu1  ;;  %v615_v14 = vmul.f32 %v535_v20, %v535_v20 }
 0x169   : > { %v474_v28 = vpop.f32.mrb[15].mxu0  ;;  %v538_v30 = vpop.f32.mrb[15].mxu1  ;;  %v602_v38 = vmul.f32 %v862_v24, %v862_v24 }
 0x16a   : > { %v630_v32 = vadd.f32 %v629_v23, %v599_v22  ;;  %v562_v33 = vadd.f32 %v561_v21, %v474_v28  ;;  %v600_v34 = vmul.f32 %v474_v28, %v474_v28  ;;  %v616_v17 = vmul.f32 %v538_v30, %v538_v30 }
 0x16b   : > { %v618_v22 = vmul.f32 %v878_v26, %v878_v26 }
 0x16c   : > { %v563_v36 = vadd.f32 %v861_v16, %v562_v33  ;;  %v631_v37 = vadd.f32 %v630_v32, %v600_v34 }
 0x16e   : > { %v632_v39 = vadd.f32 %v631_v37, %v601_v35  ;;  %v564_v40 = vadd.f32 %v862_v24, %v563_v36 }
 0x170   : > { %v565_v43 = vadd.f32 %v564_v40, %v1350_v27  ;;  %v633_v45 = vadd.f32 %v632_v39, %v602_v38  ;;  %v607_v27 = vmul.f32 %v1358_v44, %v1358_v44 }
 0x172   : > { %v634_v46 = vadd.f32 %v633_v45, %v603_v41  ;;  %v566_v47 = vadd.f32 %v565_v43, %v1354_v31 }
 0x174   : > { %v567_v52 = vadd.f32 %v1348_v25, %v566_v47  ;;  %v635_v53 = vadd.f32 %v634_v46, %v604_v48  ;;  %v609_v25 = vmul.f32 %v1356_v42, %v1356_v42 }
 0x176   : > { %v636_v55 = vadd.f32 %v635_v53, %v605_v50  ;;  %v568_v56 = vadd.f32 %v1352_v29, %v567_v52  ;;  %v610_v29 = vmul.f32 %v1360_v49, %v1360_v49 }
 0x178   : > { %v569_v57 = vadd.f32 %v568_v56, %v1358_v44  ;;  %v637_v58 = vadd.f32 %v636_v55, %v606_v54  ;;  %v611_v44 = vmul.f32 %v519_v0, %v519_v0 }
 0x17a   : > { %v638_v59 = vadd.f32 %v637_v58, %v607_v27  ;;  %v570_v31 = vadd.f32 %v569_v57, %v1362_v51  ;;  %v613_v51 = vmul.f32 %v1364_v62, %v1364_v62 }
 0x17c   : > { %v571_v61 = vadd.f32 %v1356_v42, %v570_v31  ;;  %v639_v63 = vadd.f32 %v638_v59, %v608_v60  ;;  %v614_v42 = vmul.f32 %v1366_v5, %v1366_v5 }
 0x17e   : > { %v640_v1 = vadd.f32 %v639_v63, %v609_v25  ;;  %v572_v2 = vadd.f32 %v1360_v49, %v571_v61 }
 0x180   : > { %v573_v3 = vadd.f32 %v572_v2, %v519_v0  ;;  %v641_v4 = vadd.f32 %v640_v1, %v610_v29 }
 0x182   : > { %v642_v6 = vadd.f32 %v641_v4, %v611_v44  ;;  %v574_v8 = vadd.f32 %v573_v3, %v522_v7  ;;  %v617_v7 = vmul.f32 %v877_v18, %v877_v18 }
 0x184   : > { %v575_v10 = vadd.f32 %v1364_v62, %v574_v8  ;;  %v643_v11 = vadd.f32 %v642_v6, %v612_v9 }
 0x186   : > { %v644_v12 = vadd.f32 %v643_v11, %v613_v51  ;;  %v576_v13 = vadd.f32 %v1366_v5, %v575_v10 }
 0x188   : > { %v577_v49 = vadd.f32 %v576_v13, %v535_v20  ;;  %v645_v15 = vadd.f32 %v644_v12, %v614_v42 }
 0x18a   : > { %v646_v0 = vadd.f32 %v645_v15, %v615_v14  ;;  %v578_v16 = vadd.f32 %v577_v49, %v538_v30 }
 0x18c   : > { %v579_v19 = vadd.f32 %v877_v18, %v578_v16  ;;  %v647_v21 = vadd.f32 %v646_v0, %v616_v17 }
 0x18e   : > { %v580_v62 = vadd.f32 %v878_v26, %v579_v19  ;;  %v648_v23 = vadd.f32 %v647_v21, %v617_v7 }
 0x190   : > { %v581_v24 = vrot.slane %v580_v62, 4  ;;  %v649_v28 = vadd.f32 %v648_v23, %v618_v22 }
 0x192   : > { %v582_v32 = vadd.f32 %v581_v24, %v580_v62  ;;  %v650_v33 = vrot.slane %v649_v28, 4 }
 0x194   : > { %v583_v34 = vrot.slane %v582_v32, 2  ;;  %v651_v5 = vadd.f32 %v650_v33, %v649_v28 }
 0x196   : > { %v584_v20 = vadd.f32 %v583_v34, %v582_v32  ;;  %v652_v35 = vrot.slane %v651_v5, 2 }
 0x198   : > { %v585_v36 = vrot.slane %v584_v20, 1  ;;  %v653_v30 = vadd.f32 %v652_v35, %v651_v5 }
 0x19a   : > { %v654_v37 = vrot.slane %v653_v30, 1  ;;  %v586_v18 = vadd.f32 %v585_v36, %v584_v20 }
 0x19c   : > { %v655_v26 = vadd.f32 %v654_v37, %v653_v30 }
 0x19e   : > { %v657_v38 = vsel %vm656_vm0, %v586_v18, %v655_v26 }
 0x19f   : > { %658 = vst [vmem:[%s194_s21] sm:$0x3] %v657_v38 }
 0x1a0   : > { %1065 = shalt.err (!%p1062_p5)
}
 0x1a1   : > { %s1066_s3 = scalar_lea.hbm %s1403_s5, 32  ;;  %s1070_s16 = scalar_lea.hbm %s1454_s2, 64 }
 0x1a2   : > { %p1067_p9 = scmp.ne.s32.totalorder %s1403_s5, %s1066_s3  ;;  %p1071_p3 = scmp.lt.u32.totalorder %s1403_s5, %s1454_s2 }
 0x1a3   : > { %p1072_p7 = scmp.lt.u32.totalorder %s1070_s16, %s1066_s3  ;;  %p1074_p4 = scmp.lt.u32.totalorder %s1066_s3, %s1403_s5 }
 0x1a4   : > { %p1068_p1 = pnand %p1067_p9, %p1259_p10 }
 0x1a5   : > { %p1073_p13 = por %p1072_p7, %p1071_p3 }
 0x1a6   : > { %p1069_p2 = pneg %p1068_p1 }
 0x1a7   : > { %p1075_p6 = por %p1074_p4, %p1073_p13 }
 0x1a9   : > { %p1076_p8 = pnand %p1075_p6, %p1069_p2 }
 0x1ab   : > { %1079 = shalt.err (!%p1076_p8)
}
 0x1ac   : > { %901 = dma.vmem_to_hbm [thread:$0]  (%p1259_p10), %s1405_s6, 32, %s1403_s5, %s660_s8  }
 0x1ad PF: > { %s686_s29 = sand.u32 1, %s1118_s9   ;;  %p1472_p12 = scmp.ne.s32.totalorder %s1462_s20, 0 }
 0x1ae   : > { %p1473_p11 = scmp.ge.s32.totalorder %s1138_s14, 2  ;;  %s687_s17 = scalar_lea.sflag [#allocation4], %s686_s29 }
 0x1b0   : > { %p912_p0 = pnand %p1473_p11, %p1472_p12 }
 0x1b2   : > { %1113 = dma.done.wait (!%p912_p0), %s687_s17, 32  }
 0x1b3   : > { %1115 = vsyncadd (!%p912_p0), %s687_s17, 4294967264  ;;  %s19_s14 = sadd.s32 1, %s1138_s14   ;;  %s1474_s9 = smov %s1122_s10 }
 0x1b4   : > { %p16_p5 = scmp.ge.s32.totalorder %s19_s14, 4   ;;  %s1475_s10 = smov %s1126_s11 }
 0x1b5   : > { %s1476_s11 = smov %s1268_s28  ;;  %s1477_s12 = smov %s1134_s13 }
 0x1b6   : > { %s1478_s13 = smov %s1480_s25  ;;  %18 = sbr.rel (!%p16_p5) target bundleno = 7 (0x7), region = 77 }
 0x1bd   :  { %692 = vsyncpa [#allocation3], 1 }
 0x1be   :  { %694 = vsyncpa [#allocation3 + $0x1], 1 }
 0x1bf   :  { %695 = vsyncpa [#allocation6], 1 }
 0x1c0   :  { %696 = vsyncpa [#allocation4], 1 }
 0x1c1   :  { %698 = vsyncpa [#allocation4 + $0x1], 1 }

</bundles_post_ra>
